<compile_context>
chip_gen: v5e
topology: v5e:2x2
jax: 0.10.0
libtpu: 0.0.40
codegen_flags: <defaults>
</compile_context>

<pallas_src>
import functools

import jax
import jax.numpy as jnp
from jax import lax
from jax.experimental import pallas as pl
from jax.experimental.pallas import tpu as pltpu


# ----------------------------------------------------------------------------
# Pallas kernel: fused masked cross-entropy, all views per step
#   warped_ref: (V-1, K, tile)   lane-dense warped-seg scores (any float dtype)
#   ref_ref:    (K, tile)        lane-dense reference-seg scores (f32)
#   mask_ref:   (V-1, 1, tile)   validity masks
#   out_ref:    (V-1, 2, tile)   resident accumulator: [v, 0] = CE sums, [v, 1] = counts
# ----------------------------------------------------------------------------
def _seg_ce_kernel(hw, cps, exp_dtype, warped_ref, ref_ref, mask_ref, out_ref):
    s = pl.program_id(0)   # v7x 2-TC chunk-range split (size 1 unless B == 1)
    i = pl.program_id(2)   # pixel-chunk index within this split (reduction axis)

    @pl.when(i == 0)
    def _():
        out_ref[...] = jnp.zeros_like(out_ref)

    vm1, k, tile = warped_ref.shape

    # Tail-of-image validity: the last chunk may overhang H*W; those lanes are garbage.
    lane = lax.broadcasted_iota(jnp.int32, (1, tile), 1)
    in_bounds = ((s * cps + i) * tile + lane) < hw               # (1, tile) bool

    # Target one-hot from ref_seg: computed once per pixel chunk, reused for all views.
    # Tie-break = first maximal index, matching torch.argmax.
    r = ref_ref[...].astype(jnp.float32)                         # (K, tile)
    kidx = lax.broadcasted_iota(jnp.int32, (k, tile), 0)
    rmax = jnp.max(r, axis=0, keepdims=True)                     # (1, tile)
    tgt = jnp.min(jnp.where(r == rmax, kidx, k), axis=0, keepdims=True)
    onehot = kidx == tgt                                         # (K, tile) bool, in vregs

    zero = jnp.zeros((1, tile), jnp.float32)                     # hoisted broadcasts
    one = jnp.ones((1, tile), jnp.float32)

    for v in range(vm1):                                         # views folded into block
        w = warped_ref[v].astype(jnp.float32)                    # (K, tile), f32 math
        m = mask_ref[v].astype(jnp.float32)                      # (1, tile)

        # Numerically stable log-sum-exp over the (sublane) cluster axis.
        mx = jnp.max(w, axis=0, keepdims=True)                   # (1, tile)
        p = jnp.exp((w - mx).astype(exp_dtype)).astype(jnp.float32)
        lse = mx + jnp.log(jnp.sum(p, axis=0, keepdims=True))
        w_t = jnp.sum(jnp.where(onehot, w, 0.0), axis=0, keepdims=True)
        ce = lse - w_t                                           # (1, tile) per-pixel CE

        valid = (m > 0.5) & in_bounds
        # select (not multiply): NaN/Inf from overhang lanes must not poison the sums
        contrib = jnp.concatenate(
            [jnp.where(valid, ce, zero), jnp.where(valid, one, zero)], axis=0)  # (2, tile)
        out_ref[v] = out_ref[v] + contrib


def compute_seg_losses_pallas(warped_all, ref_seg, mask_all, *, max_tile=4096,
                              exp_dtype=jnp.float32):
    """Per-view masked cross-entropy losses.

    warped_all: [B, V-1, K, HW] (f32 or bf16); ref_seg: [B, K, HW] (keep f32);
    mask_all: [B, V-1, 1, HW]. Returns per-view losses, shape (V-1,).
    exp_dtype=jnp.bfloat16 enables the v6e/v7x bf16-EUP exp (do NOT use on v5e).
    """
    B, Vm1, K, HW = warped_all.shape
    assert ref_seg.shape == (B, K, HW)
    assert mask_all.shape == (B, Vm1, 1, HW)

    if HW <= max_tile:
        tile = HW                      # full-dim block (exempt from the 128 rule)
    else:
        assert max_tile % 128 == 0, "max_tile must be a multiple of 128 when HW > max_tile"
        tile = max_tile
    n_chunks = pl.cdiv(HW, tile)

    # v7x: when B == 1 the batch axis alone can't feed both TensorCores; split the
    # chunk range across a leading parallel axis instead (no-op on v5e/v6e).
    n_split = 2 if (B == 1 and n_chunks >= 2 and n_chunks % 2 == 0) else 1
    cps = n_chunks // n_split          # chunks per split

    kernel = functools.partial(_seg_ce_kernel, HW, cps, exp_dtype)

    out = pl.pallas_call(
        kernel,
        out_shape=jax.ShapeDtypeStruct((n_split, B, Vm1, 2, tile), jnp.float32),
        grid_spec=pltpu.PrefetchScalarGridSpec(
            num_scalar_prefetch=0,
            grid=(n_split, B, cps),
            in_specs=[
                # warped: whole view slab per step (leading batch dim squeezed)
                pl.BlockSpec((None, Vm1, K, tile),
                             lambda s, b, i: (b, 0, 0, s * cps + i)),
                # ref: view-invariant, DMA'd once per pixel chunk
                pl.BlockSpec((None, K, tile),
                             lambda s, b, i: (b, 0, s * cps + i)),
                # mask: whole view slab per step
                pl.BlockSpec((None, Vm1, 1, tile),
                             lambda s, b, i: (b, 0, 0, s * cps + i)),
            ],
            # resident accumulator: block index independent of the chunk axis
            out_specs=pl.BlockSpec((None, None, Vm1, 2, tile),
                                   lambda s, b, i: (s, b, 0, 0, 0)),
        ),
        compiler_params=pltpu.CompilerParams(
            dimension_semantics=("parallel", "parallel", "arbitrary"),
        ),
    )(warped_all, ref_seg, mask_all)

    tot = jnp.sum(out, axis=(0, 1, 4))          # (V-1, 2): tiny final reduction in XLA
    sum_v, cnt_v = tot[:, 0], tot[:, 1]
    # torch's F.cross_entropy on an empty selection gives NaN; return 0 instead when
    # no pixel passes the mask (flagged correctness concern, kept intentionally).
    return jnp.where(cnt_v > 0, sum_v / jnp.maximum(cnt_v, 1.0), 0.0)


# ----------------------------------------------------------------------------
# Glue (plain JAX): SegDFF stand-in, bilinear resize, warping stand-in
# ----------------------------------------------------------------------------
def seg_dff_standin(imgs, proj_w):
    # TODO(synk): SegDFF (deep-feature-factorization / NMF, max_iter=50) source not
    # provided; deterministic avg-pool + 1x1-projection + softmax stand-in instead.
    B, V, C, H, W = imgs.shape
    Hc, Wc = H // 4, W // 4
    x = imgs.reshape(B, V, C, Hc, 4, Wc, 4).mean(axis=(4, 6))      # [B,V,C,Hc,Wc]
    x = jnp.einsum("bvchw,ck->bvhwk", x, proj_w)                   # [B,V,Hc,Wc,K]
    return jax.nn.softmax(x, axis=-1)


def inverse_warping_standin(view_segs_nchw, ref_cam, view_cams, depth):
    # TODO(synk): inverse_warping (camera-geometry reprojection) source not provided;
    # identity warp + depth-validity mask stand-in, vectorized over views so the warped
    # tensor is emitted directly in the packed [B, V-1, K, H, W] layout (no extra
    # stack/reshape HBM round-trip before the loss kernel).
    del ref_cam, view_cams
    B, Vm1, K, H, W = view_segs_nchw.shape
    mask = (depth > 0.0).astype(view_segs_nchw.dtype)[:, None, None, :, :]  # [B,1,1,H,W]
    mask = jnp.broadcast_to(mask, (B, Vm1, 1, H, W))
    return view_segs_nchw, mask


def unsup_seg_loss_forward(imgs, cams, depth, proj_w, *, loss_input_dtype=jnp.bfloat16):
    """imgs: [B,V,3,Hi,Wi]; cams: [B,V,2,4,4]; depth: [B,H,W]."""
    B, V = imgs.shape[0], imgs.shape[1]
    H, W = depth.shape[1], depth.shape[2]
    K = proj_w.shape[1]

    seg_maps = seg_dff_standin(imgs, proj_w)                    # [B,V,Hc,Wc,K]
    seg_maps = jnp.transpose(seg_maps, (0, 1, 4, 2, 3))         # [B,V,K,Hc,Wc]

    # bilinear resize of all views at once, channels-first (matches
    # F.interpolate(mode='bilinear', align_corners=False) semantics)
    seg_hw = jax.image.resize(seg_maps, (B, V, K, H, W), method="bilinear")

    ref_nchw = seg_hw[:, 0]                                     # [B,K,H,W]
    view_nchw = seg_hw[:, 1:]                                   # [B,V-1,K,H,W]

    # NHWC copies only for the module's returned tensors
    ref_seg = jnp.transpose(ref_nchw, (0, 2, 3, 1))             # [B,H,W,K]
    view_segs = jnp.transpose(view_nchw, (0, 1, 3, 4, 2))       # [B,V-1,H,W,K]

    warped_nchw, mask = inverse_warping_standin(view_nchw, cams[:, 0], cams[:, 1:], depth)

    # bf16 inputs to the mem-bound loss kernel (v5e/v6e ~2x less HBM traffic);
    # ref stays f32 so the argmax target matches the f32 torch path for near-ties.
    warped_all = warped_nchw.reshape(B, V - 1, K, H * W).astype(loss_input_dtype)
    mask_all = mask.reshape(B, V - 1, 1, H * W).astype(loss_input_dtype)
    ref_flat = ref_nchw.reshape(B, K, H * W)

    per_view_losses = compute_seg_losses_pallas(warped_all, ref_flat, mask_all)
    reproj_seg_loss = jnp.sum(per_view_losses) * 1.0
    return reproj_seg_loss, ref_seg, view_segs


# ----------------------------------------------------------------------------
# Pure-JAX reference of compute_seg_loss (for correctness spot-checks)
# ----------------------------------------------------------------------------
def compute_seg_loss_ref(warped, ref, mask):
    """warped, ref: [B, K, HW]; mask: [B, HW]."""
    K = warped.shape[1]
    w = jnp.swapaxes(warped, 1, 2).reshape(-1, K).astype(jnp.float32)
    r = jnp.swapaxes(ref, 1, 2).reshape(-1, K).astype(jnp.float32)
    m = mask.reshape(-1).astype(jnp.float32) > 0.5
    tgt = jnp.argmax(r, axis=1)
    lse = jax.scipy.special.logsumexp(w, axis=1)
    ce = lse - jnp.take_along_axis(w, tgt[:, None], axis=1)[:, 0]
    return jnp.sum(jnp.where(m, ce, 0.0)) / jnp.sum(m.astype(jnp.float32))


# ----------------------------------------------------------------------------
if __name__ == "__main__":
    key = jax.random.PRNGKey(0)
    k_img, k_cam, k_depth, k_w = jax.random.split(key, 4)

    B, V, C = 2, 3, 3
    Hi = Wi = 32          # image resolution
    H = W = 16            # depth resolution
    K = 8                 # args.seg_clusters

    imgs = jax.random.uniform(k_img, (B, V, C, Hi, Wi), dtype=jnp.float32)
    cams = jax.random.normal(k_cam, (B, V, 2, 4, 4), dtype=jnp.float32)
    depth = jax.random.normal(k_depth, (B, H, W), dtype=jnp.float32)   # ~half > 0
    proj_w = jax.random.normal(k_w, (C, K), dtype=jnp.float32)         # SegDFF stand-in params

    loss, ref_seg, view_segs = unsup_seg_loss_forward(imgs, cams, depth, proj_w)
    jax.block_until_ready((loss, ref_seg, view_segs))

    # --- spot-check 1: fused kernel vs pure-JAX reference (same bf16 inputs) ---
    seg_maps = jnp.transpose(seg_dff_standin(imgs, proj_w), (0, 1, 4, 2, 3))
    seg_hw = jax.image.resize(seg_maps, (B, V, K, H, W), method="bilinear")
    ref_flat = seg_hw[:, 0].reshape(B, K, H * W)
    warped_bf = seg_hw[:, 1:].reshape(B, V - 1, K, H * W).astype(jnp.bfloat16)
    mask_f32 = (depth > 0.0).astype(jnp.float32).reshape(B, H * W)
    mask_bf = jnp.broadcast_to(mask_f32[:, None, None, :],
                               (B, V - 1, 1, H * W)).astype(jnp.bfloat16)

    got = compute_seg_losses_pallas(warped_bf, ref_flat, mask_bf)
    want = jnp.stack([compute_seg_loss_ref(warped_bf[:, v].astype(jnp.float32),
                                           ref_flat, mask_f32)
                      for v in range(V - 1)])
    jax.block_until_ready((got, want))
    assert jnp.allclose(got, want, atol=1e-4, rtol=1e-4), (got, want)
    assert jnp.allclose(loss, jnp.sum(want), atol=1e-4, rtol=1e-4), (loss, jnp.sum(want))
    assert jnp.isfinite(loss)
    assert ref_seg.shape == (B, H, W, K)
    assert view_segs.shape == (B, V - 1, H, W, K)

    # --- spot-check 2: tiled path with a tail chunk (HW not a multiple of tile) ---
    HW2 = 320   # 3 chunks of 128 with a 64-lane tail
    kk = jax.random.split(key, 3)
    warped2 = jax.random.normal(kk[0], (B, V - 1, K, HW2), jnp.float32).astype(jnp.bfloat16)
    ref2 = jax.random.normal(kk[1], (B, K, HW2), jnp.float32)
    mask2_f32 = (jax.random.normal(kk[2], (B, HW2)) > 0.0).astype(jnp.float32)
    mask2 = jnp.broadcast_to(mask2_f32[:, None, None, :],
                             (B, V - 1, 1, HW2)).astype(jnp.bfloat16)
    got2 = compute_seg_losses_pallas(warped2, ref2, mask2, max_tile=128)
    want2 = jnp.stack([compute_seg_loss_ref(warped2[:, v].astype(jnp.float32), ref2, mask2_f32)
                       for v in range(V - 1)])
    jax.block_until_ready((got2, want2))
    assert jnp.allclose(got2, want2, atol=1e-4, rtol=1e-4), (got2, want2)

    # --- spot-check 3: B == 1 two-way chunk split (v7x 2-TC path) ---
    got3 = compute_seg_losses_pallas(warped_bf[:1], ref_flat[:1], mask_bf[:1], max_tile=128)
    want3 = jnp.stack([compute_seg_loss_ref(warped_bf[:1, v].astype(jnp.float32),
                                            ref_flat[:1], mask_f32[:1])
                       for v in range(V - 1)])
    jax.block_until_ready((got3, want3))
    assert jnp.allclose(got3, want3, atol=1e-4, rtol=1e-4), (got3, want3)

    print("KERNEL_OK")
</pallas_src>

<mosaic_0001>
module attributes {stable_mosaic.version = 11 : i64} {
  func.func @_seg_ce_kernel(%arg0: i32, %arg1: i32, %arg2: i32, %arg3: memref<1x2x8x256xbf16, #tpu.memory_space<vmem>>, %arg4: memref<1x8x256xf32, #tpu.memory_space<vmem>>, %arg5: memref<1x2x1x256xbf16, #tpu.memory_space<vmem>>, %arg6: memref<1x1x2x2x256xf32, #tpu.memory_space<vmem>>) attributes {dimension_semantics = [#tpu.dimension_semantics<parallel>, #tpu.dimension_semantics<parallel>, #tpu.dimension_semantics<arbitrary>], iteration_bounds = array<i64: 1, 2, 1>, scalar_prefetch = 0 : i64, scratch_operands = 0 : i64, tpu.core_type = #tpu.core_type<tc>, window_params = [{transform_indices = @transform_0, window_bounds = array<i64: 1, 2, 8, 256>}, {transform_indices = @transform_1, window_bounds = array<i64: 1, 8, 256>}, {transform_indices = @transform_2, window_bounds = array<i64: 1, 2, 1, 256>}, {transform_indices = @transform_3, window_bounds = array<i64: 1, 1, 2, 2, 256>}]} {
    %c0_i32 = arith.constant 0 : i32
    %0 = arith.cmpi eq, %arg2, %c0_i32 : i32
    %1 = arith.extui %0 : i1 to i32
    %c0_i32_0 = arith.constant 0 : i32
    %2 = arith.cmpi ne, %1, %c0_i32_0 : i32
    scf.if %2 {
      %cst_52 = arith.constant 0.000000e+00 : f32
      %90 = vector.broadcast %cst_52 : f32 to vector<2x2x256xf32>
      %c0_53 = arith.constant 0 : index
      %c0_54 = arith.constant 0 : index
      %c0_55 = arith.constant 0 : index
      %c0_56 = arith.constant 0 : index
      %c0_57 = arith.constant 0 : index
      %91 = vector.load %arg6[%c0_53, %c0_54, %c0_55, %c0_56, %c0_57] : memref<1x1x2x2x256xf32, #tpu.memory_space<vmem>>, vector<1x1x2x2x256xf32>
      %92 = vector.shape_cast %91 : vector<1x1x2x2x256xf32> to vector<2x2x256xf32>
      %93 = vector.shape_cast %90 : vector<2x2x256xf32> to vector<1x1x2x2x256xf32>
      tpu.vector_store %arg6[%c0_53, %c0_54, %c0_55, %c0_56, %c0_57], %93 {strides = array<i32>} : memref<1x1x2x2x256xf32, #tpu.memory_space<vmem>>, vector<1x1x2x2x256xf32>,
    } else {
    }
    %3 = tpu.iota {dimensions = array<i32: 1>} : vector<1x256xi32>
    %c1_i32 = arith.constant 1 : i32
    %4 = arith.muli %arg0, %c1_i32 : i32
    %5 = arith.addi %4, %arg2 : i32
    %c256_i32 = arith.constant 256 : i32
    %6 = arith.muli %5, %c256_i32 : i32
    %7 = vector.broadcast %6 : i32 to vector<1x256xi32>
    %8 = arith.addi %7, %3 : vector<1x256xi32>
    %c256_i32_1 = arith.constant 256 : i32
    %9 = vector.broadcast %c256_i32_1 : i32 to vector<1x256xi32>
    %10 = arith.cmpi slt, %8, %9 : vector<1x256xi32>
    %c0 = arith.constant 0 : index
    %c0_2 = arith.constant 0 : index
    %c0_3 = arith.constant 0 : index
    %11 = vector.load %arg4[%c0, %c0_2, %c0_3] : memref<1x8x256xf32, #tpu.memory_space<vmem>>, vector<1x8x256xf32>
    %12 = vector.shape_cast %11 : vector<1x8x256xf32> to vector<8x256xf32>
    %13 = tpu.iota {dimensions = array<i32: 0>} : vector<8x256xi32>
    %cst = arith.constant dense<0xFF800000> : vector<256xf32>
    %14 = vector.multi_reduction <maximumf>, %12, %cst [0] : vector<8x256xf32> to vector<256xf32>
    %15 = vector.shape_cast %14 : vector<256xf32> to vector<1x256xf32>
    %16 = vector.broadcast %15 : vector<1x256xf32> to vector<8x256xf32>
    %17 = arith.cmpf oeq, %12, %16 : vector<8x256xf32>
    %c8_i32 = arith.constant 8 : i32
    %18 = vector.broadcast %c8_i32 : i32 to vector<8x256xi32>
    %19 = arith.select %17, %13, %18 : vector<8x256xi1>, vector<8x256xi32>
    %cst_4 = arith.constant dense<2147483647> : vector<256xi32>
    %20 = vector.multi_reduction <minsi>, %19, %cst_4 [0] : vector<8x256xi32> to vector<256xi32>
    %21 = vector.shape_cast %20 : vector<256xi32> to vector<1x256xi32>
    %22 = vector.broadcast %21 : vector<1x256xi32> to vector<8x256xi32>
    %23 = arith.cmpi eq, %13, %22 : vector<8x256xi32>
    %cst_5 = arith.constant 0.000000e+00 : f32
    %24 = vector.broadcast %cst_5 : f32 to vector<1x256xf32>
    %cst_6 = arith.constant 1.000000e+00 : f32
    %25 = vector.broadcast %cst_6 : f32 to vector<1x256xf32>
    %c0_7 = arith.constant 0 : index
    %c0_8 = arith.constant 0 : index
    %c0_9 = arith.constant 0 : index
    %c0_10 = arith.constant 0 : index
    %26 = vector.load %arg3[%c0_7, %c0_8, %c0_9, %c0_10] : memref<1x2x8x256xbf16, #tpu.memory_space<vmem>>, vector<1x1x8x256xbf16>
    %27 = vector.shape_cast %26 : vector<1x1x8x256xbf16> to vector<8x256xbf16>
    %28 = arith.extf %27 : vector<8x256xbf16> to vector<8x256xf32>
    %c0_11 = arith.constant 0 : index
    %c0_12 = arith.constant 0 : index
    %c0_13 = arith.constant 0 : index
    %c0_14 = arith.constant 0 : index
    %29 = vector.load %arg5[%c0_11, %c0_12, %c0_13, %c0_14] : memref<1x2x1x256xbf16, #tpu.memory_space<vmem>>, vector<1x1x1x256xbf16>
    %30 = vector.shape_cast %29 : vector<1x1x1x256xbf16> to vector<1x256xbf16>
    %31 = arith.extf %30 : vector<1x256xbf16> to vector<1x256xf32>
    %cst_15 = arith.constant dense<0xFF800000> : vector<256xf32>
    %32 = vector.multi_reduction <maximumf>, %28, %cst_15 [0] : vector<8x256xf32> to vector<256xf32>
    %33 = vector.shape_cast %32 : vector<256xf32> to vector<1x256xf32>
    %34 = vector.broadcast %33 : vector<1x256xf32> to vector<8x256xf32>
    %35 = arith.subf %28, %34 : vector<8x256xf32>
    %36 = math.exp %35 : vector<8x256xf32>
    %cst_16 = arith.constant dense<0.000000e+00> : vector<256xf32>
    %37 = vector.multi_reduction <add>, %36, %cst_16 [0] : vector<8x256xf32> to vector<256xf32>
    %38 = vector.shape_cast %37 : vector<256xf32> to vector<1x256xf32>
    %39 = math.log %38 : vector<1x256xf32>
    %40 = arith.addf %33, %39 : vector<1x256xf32>
    %cst_17 = arith.constant 0.000000e+00 : f32
    %41 = vector.broadcast %cst_17 : f32 to vector<8x256xf32>
    %42 = arith.select %23, %28, %41 : vector<8x256xi1>, vector<8x256xf32>
    %cst_18 = arith.constant dense<0.000000e+00> : vector<256xf32>
    %43 = vector.multi_reduction <add>, %42, %cst_18 [0] : vector<8x256xf32> to vector<256xf32>
    %44 = vector.shape_cast %43 : vector<256xf32> to vector<1x256xf32>
    %45 = arith.subf %40, %44 : vector<1x256xf32>
    %cst_19 = arith.constant 5.000000e-01 : f32
    %46 = vector.broadcast %cst_19 : f32 to vector<1x256xf32>
    %47 = arith.cmpf ogt, %31, %46 : vector<1x256xf32>
    %48 = arith.andi %47, %10 : vector<1x256xi1>
    %49 = arith.select %48, %45, %24 : vector<1x256xi1>, vector<1x256xf32>
    %50 = arith.select %48, %25, %24 : vector<1x256xi1>, vector<1x256xf32>
    %51 = tpu.concatenate %49, %50 in 0 : vector<1x256xf32>, vector<1x256xf32> -> vector<2x256xf32>
    %c0_20 = arith.constant 0 : index
    %c0_21 = arith.constant 0 : index
    %c0_22 = arith.constant 0 : index
    %c0_23 = arith.constant 0 : index
    %c0_24 = arith.constant 0 : index
    %52 = vector.load %arg6[%c0_20, %c0_21, %c0_22, %c0_23, %c0_24] : memref<1x1x2x2x256xf32, #tpu.memory_space<vmem>>, vector<1x1x1x2x256xf32>
    %53 = vector.shape_cast %52 : vector<1x1x1x2x256xf32> to vector<2x256xf32>
    %54 = arith.addf %53, %51 : vector<2x256xf32>
    %c0_25 = arith.constant 0 : index
    %c0_26 = arith.constant 0 : index
    %c0_27 = arith.constant 0 : index
    %c0_28 = arith.constant 0 : index
    %c0_29 = arith.constant 0 : index
    %55 = vector.load %arg6[%c0_25, %c0_26, %c0_27, %c0_28, %c0_29] : memref<1x1x2x2x256xf32, #tpu.memory_space<vmem>>, vector<1x1x1x2x256xf32>
    %56 = vector.shape_cast %55 : vector<1x1x1x2x256xf32> to vector<2x256xf32>
    %57 = vector.shape_cast %54 : vector<2x256xf32> to vector<1x1x1x2x256xf32>
    tpu.vector_store %arg6[%c0_25, %c0_26, %c0_27, %c0_28, %c0_29], %57 {strides = array<i32>} : memref<1x1x2x2x256xf32, #tpu.memory_space<vmem>>, vector<1x1x1x2x256xf32>,
    %c0_30 = arith.constant 0 : index
    %c1 = arith.constant 1 : index
    %c0_31 = arith.constant 0 : index
    %c0_32 = arith.constant 0 : index
    %58 = vector.load %arg3[%c0_30, %c1, %c0_31, %c0_32] : memref<1x2x8x256xbf16, #tpu.memory_space<vmem>>, vector<1x1x8x256xbf16>
    %59 = vector.shape_cast %58 : vector<1x1x8x256xbf16> to vector<8x256xbf16>
    %60 = arith.extf %59 : vector<8x256xbf16> to vector<8x256xf32>
    %c0_33 = arith.constant 0 : index
    %c1_34 = arith.constant 1 : index
    %c0_35 = arith.constant 0 : index
    %c0_36 = arith.constant 0 : index
    %61 = vector.load %arg5[%c0_33, %c1_34, %c0_35, %c0_36] : memref<1x2x1x256xbf16, #tpu.memory_space<vmem>>, vector<1x1x1x256xbf16>
    %62 = vector.shape_cast %61 : vector<1x1x1x256xbf16> to vector<1x256xbf16>
    %63 = arith.extf %62 : vector<1x256xbf16> to vector<1x256xf32>
    %cst_37 = arith.constant dense<0xFF800000> : vector<256xf32>
    %64 = vector.multi_reduction <maximumf>, %60, %cst_37 [0] : vector<8x256xf32> to vector<256xf32>
    %65 = vector.shape_cast %64 : vector<256xf32> to vector<1x256xf32>
    %66 = vector.broadcast %65 : vector<1x256xf32> to vector<8x256xf32>
    %67 = arith.subf %60, %66 : vector<8x256xf32>
    %68 = math.exp %67 : vector<8x256xf32>
    %cst_38 = arith.constant dense<0.000000e+00> : vector<256xf32>
    %69 = vector.multi_reduction <add>, %68, %cst_38 [0] : vector<8x256xf32> to vector<256xf32>
    %70 = vector.shape_cast %69 : vector<256xf32> to vector<1x256xf32>
    %71 = math.log %70 : vector<1x256xf32>
    %72 = arith.addf %65, %71 : vector<1x256xf32>
    %cst_39 = arith.constant 0.000000e+00 : f32
    %73 = vector.broadcast %cst_39 : f32 to vector<8x256xf32>
    %74 = arith.select %23, %60, %73 : vector<8x256xi1>, vector<8x256xf32>
    %cst_40 = arith.constant dense<0.000000e+00> : vector<256xf32>
    %75 = vector.multi_reduction <add>, %74, %cst_40 [0] : vector<8x256xf32> to vector<256xf32>
    %76 = vector.shape_cast %75 : vector<256xf32> to vector<1x256xf32>
    %77 = arith.subf %72, %76 : vector<1x256xf32>
    %cst_41 = arith.constant 5.000000e-01 : f32
    %78 = vector.broadcast %cst_41 : f32 to vector<1x256xf32>
    %79 = arith.cmpf ogt, %63, %78 : vector<1x256xf32>
    %80 = arith.andi %79, %10 : vector<1x256xi1>
    %81 = arith.select %80, %77, %24 : vector<1x256xi1>, vector<1x256xf32>
    %82 = arith.select %80, %25, %24 : vector<1x256xi1>, vector<1x256xf32>
    %83 = tpu.concatenate %81, %82 in 0 : vector<1x256xf32>, vector<1x256xf32> -> vector<2x256xf32>
    %c0_42 = arith.constant 0 : index
    %c0_43 = arith.constant 0 : index
    %c1_44 = arith.constant 1 : index
    %c0_45 = arith.constant 0 : index
    %c0_46 = arith.constant 0 : index
    %84 = vector.load %arg6[%c0_42, %c0_43, %c1_44, %c0_45, %c0_46] : memref<1x1x2x2x256xf32, #tpu.memory_space<vmem>>, vector<1x1x1x2x256xf32>
    %85 = vector.shape_cast %84 : vector<1x1x1x2x256xf32> to vector<2x256xf32>
    %86 = arith.addf %85, %83 : vector<2x256xf32>
    %c0_47 = arith.constant 0 : index
    %c0_48 = arith.constant 0 : index
    %c1_49 = arith.constant 1 : index
    %c0_50 = arith.constant 0 : index
    %c0_51 = arith.constant 0 : index
    %87 = vector.load %arg6[%c0_47, %c0_48, %c1_49, %c0_50, %c0_51] : memref<1x1x2x2x256xf32, #tpu.memory_space<vmem>>, vector<1x1x1x2x256xf32>
    %88 = vector.shape_cast %87 : vector<1x1x1x2x256xf32> to vector<2x256xf32>
    %89 = vector.shape_cast %86 : vector<2x256xf32> to vector<1x1x1x2x256xf32>
    tpu.vector_store %arg6[%c0_47, %c0_48, %c1_49, %c0_50, %c0_51], %89 {strides = array<i32>} : memref<1x1x2x2x256xf32, #tpu.memory_space<vmem>>, vector<1x1x1x2x256xf32>,
    return
  }
  func.func @transform_0(%arg0: i32, %arg1: i32, %arg2: i32) -> (i32, i32, i32, i32) {
    %c1_i32 = arith.constant 1 : i32
    %0 = arith.muli %arg0, %c1_i32 : i32
    %1 = arith.addi %0, %arg2 : i32
    %c0_i32 = arith.constant 0 : i32
    %c0_i32_0 = arith.constant 0 : i32
    %c0_i32_1 = arith.constant 0 : i32
    return %arg1, %c0_i32, %c0_i32_0, %1 : i32, i32, i32, i32
  }
  func.func @transform_1(%arg0: i32, %arg1: i32, %arg2: i32) -> (i32, i32, i32) {
    %c1_i32 = arith.constant 1 : i32
    %0 = arith.muli %arg0, %c1_i32 : i32
    %1 = arith.addi %0, %arg2 : i32
    %c0_i32 = arith.constant 0 : i32
    %c0_i32_0 = arith.constant 0 : i32
    return %arg1, %c0_i32, %1 : i32, i32, i32
  }
  func.func @transform_2(%arg0: i32, %arg1: i32, %arg2: i32) -> (i32, i32, i32, i32) {
    %c1_i32 = arith.constant 1 : i32
    %0 = arith.muli %arg0, %c1_i32 : i32
    %1 = arith.addi %0, %arg2 : i32
    %c0_i32 = arith.constant 0 : i32
    %c0_i32_0 = arith.constant 0 : i32
    %c0_i32_1 = arith.constant 0 : i32
    return %arg1, %c0_i32, %c0_i32_0, %1 : i32, i32, i32, i32
  }
  func.func @transform_3(%arg0: i32, %arg1: i32, %arg2: i32) -> (i32, i32, i32, i32, i32) {
    %c0_i32 = arith.constant 0 : i32
    %c0_i32_0 = arith.constant 0 : i32
    %c0_i32_1 = arith.constant 0 : i32
    %c0_i32_2 = arith.constant 0 : i32
    return %arg0, %arg1, %c0_i32, %c0_i32_0, %c0_i32_1 : i32, i32, i32, i32, i32
  }
}

</mosaic_0001>

<bundles_post_ra>
// kernel: tpu_custom_call.1
= control target key start
LH: loop header
LB: loop body
LE: loop exit
PB: predicated region body
PF: predicated region fallthrough
CT: control target
= control target key end

     0   :  { %s1220_s0 = inlined_call_operand.hbm [shape: bf16[2,2,8,256], index: 0, kind: input, shape index: {}]   ;;  %s1221_s1 = inlined_call_operand.hbm [shape: f32[2,8,256], index: 1, kind: input, shape index: {}]   ;;  %s1222_s2 = inlined_call_operand.vmem [shape: bf16[2,2,1,256], index: 2, kind: input, shape index: {}]   ;;  %s1223_s3 = inlined_call_operand.hbm [shape: f32[1,2,2,2,256], index: 3, kind: output, shape index: {}]  }
   0x1   :  { %1224 = sst [smem:[#allocation11_spill]] %s1220_s0 }
   0x2   :  { %8 = vsyncpa [#allocation3], 0 }
   0x3   :  { %10 = vsyncpa [#allocation3 + $0x1], 0 }
   0x4   :  { %11 = vsyncpa [#allocation6], 0 }
   0x5   :  { %13 = vsyncpa [#allocation6 + $0x1], 0 }
   0x6   :  { %14 = vsyncpa [#allocation4], 0 }
   0x7   :  { %16 = vsyncpa [#allocation4 + $0x1], 0  ;;  %s989_s12 = smov 0   ;;  %s991_s13 = smov 0  }
   0x8   :  { %s993_s14 = smov 0   ;;  %s995_s15 = smov 0  }
   0x9   :  { %s997_s16 = smov 0   ;;  %s999_s17 = smov 0  }
   0xa LB: > { %s699_s18 = sadd.s32 4294967295, %s961_s17   ;;  %s700_s19 = sadd.s32 4294967294, %s961_s17   ;;  %s961_s17 = sphi %s999_s17, %s22_s17   ;;  %s957_s16 = sphi %s997_s16, %s1239_s16   ;;  %s953_s15 = sphi %s995_s15, %s1238_s15   ;;  %s949_s14 = sphi %s993_s14, %s1237_s14   ;;  %s945_s13 = sphi %s991_s13, %s1236_s13   ;;  %s941_s12 = sphi %s989_s12, %s1235_s12  }
   0xb   : > { %s37_s20 = sadd.s32 1, %s957_s16  ;;  %s52_s21 = sadd.s32 1, %s949_s14 }
   0xc   : > { %p39_p0 = scmp.ge.s32.totalorder %s37_s20, 2  ;;  %p59_p1 = scmp.ne.s32.totalorder %s949_s14, %s945_s13 }
   0xd   : > { %p60_p2 = scmp.eq.s32.totalorder %s961_s17, 0  ;;  %p65_p3 = scmp.ne.s32.totalorder %s945_s13, %s941_s12 }
   0xe   : > { %s1241_s20 = smov (%p39_p0, %s37_s20), 0  ;;  %p66_p5 = scmp.eq.s32.totalorder %s699_s18, 0 }
   0xf   : > { %p1030_p4 = por %p60_p2, %p59_p1  ;;  %s47_s23 = ssub.s32 %s957_s16, %s1241_s20 }
  0x10   : > { %p151_p6 = scmp.eq.s32.totalorder %s699_s18, 1  ;;  %p50_p7 = scmp.eq.s32.totalorder %s47_s23, 0 }
  0x11   : > { %p1036_p8 = por %p66_p5, %p65_p3  ;;  %p157_p10 = scmp.eq.s32.totalorder %s700_s19, 1 }
  0x12   : > { %p1040_p9 = por %p151_p6, %p59_p1  ;;  %p702_p12 = scmp.ge.s32.totalorder %s961_s17, 2 }
  0x13   : > { %s1045_s26 = scalar_select %p50_p7, %s949_s14, %s52_s21  }
  0x14   : > { %p1047_p11 = por %p157_p10, %p65_p3  ;;  %p743_p13 = scmp.lt.s32.totalorder %s961_s17, 2 }
  0x15   : > { %s177_s28 = sand.u32 1, %s949_s14   ;;  %s723_s30 = sshll.u32 %s957_s16, 4 }
  0x16   : > { %s703_s29 = sshll.u32 %s177_s28, 4  ;;  %s1229_s0 = sld [smem:[#allocation11_spill]] }
  0x17   : > { %s181_s7 = scalar_lea.vmem [#allocation2], %s703_s29  ;;  %p1060_p0 = pnand %p743_p13, %p1030_p4 }
  0x18   : > { %s192_s8 = sshll.u32 %s181_s7, 4  ;;  %p709_p1 = scmp.ge.s32.totalorder %s961_s17, 1  ;;  %s193_s8 = int_to_ptr.vmem [resolvable:$true] %s192_s8 }
  0x19   : > { %s178_s11 = scalar_lea.sflag [#allocation3], %s177_s28  ;;  %s963_s18 = smov 128  }
  0x1a   : > { %s964_s19 = smov 8   ;;  %p237_p2 = scmp.lt.s32.totalorder %s961_s17, 3 }
  0x1b   : > { %s214_s4 = scalar_lea.hbm %s1221_s1, %s723_s30  ;;  %s206_s22 = scalar_lea.vmem [#allocation5], %s703_s29 }
  0x1c   : > { %s189_s6 = scalar_lea.hbm %s1229_s0, %s723_s30  ;;  %p238_p3 = pnand %p709_p1, %p237_p2 }
  0x1d   : > { %s190_s9 = sshll.u32 %s189_s6, 4  ;;  %s216_s5 = sshll.u32 %s214_s4, 4  ;;  %s191_s9 = int_to_ptr.hbm [resolvable:$true] %s190_s9  ;;  %s217_s5 = int_to_ptr.hbm [resolvable:$true] %s216_s5 }
  0x1e   : > { %735 = dma.hbm_to_vmem [thread:$0]  (!%p1060_p0), %s191_s9, 256, %s193_s8, %s178_s11, %s963_s18, %s963_s18, %s964_s19  }
  0x1f   : > { %s218_s6 = sshll.u32 %s206_s22, 4  ;;  %s203_s7 = scalar_lea.sflag [#allocation6], %s177_s28  ;;  %s219_s6 = int_to_ptr.vmem [resolvable:$true] %s218_s6 }
  0x20   : > { %738 = dma.hbm_to_vmem [thread:$0]  (!%p1060_p0), %s217_s5, 256, %s219_s6, %s203_s7  }
  0x21   : > { %241 = sbr.rel (%p238_p3) target bundleno = 112 (0x70), region = 32  ;;  %s1074_s0 = sand.u32 (!%p238_p3), 1, %s945_s13  }
  0x22   : > { %s710_s8 = sshll.u32 (!%p238_p3), %s1074_s0, 4  ;;  %s244_s9 = scalar_lea.sflag (!%p238_p3), [#allocation3], %s1074_s0 }
  0x23   : > { %s247_s11 = scalar_lea.vmem (!%p238_p3), [#allocation2], %s710_s8 }
  0x26   : > { %928 = dma.done.wait (%p1036_p8), %s244_s9, 256  }
  0x27   : > { %930 = vsyncadd (%p1036_p8), %s244_s9, 4294967040  ;;  %s254_s28 = scalar_lea.sflag [#allocation6], %s1074_s0  ;;  %s257_s29 = scalar_lea.vmem [#allocation5], %s710_s8 }
  0x28   : > { %932 = dma.done.wait (%p1036_p8), %s254_s28, 256  }
  0x29   : > { %934 = vsyncadd (%p1036_p8), %s254_s28, 4294967040  ;;  %s712_s30 = sshll.u32 %s1074_s0, 3  ;;  %v965_v0 = vmov 0.0   ;;  %v326_v1 = vld [vmem:[%s257_s29] sm:$0xff]  ;;  %v327_v2 = vld [vmem:[%s257_s29 + $0x8] sm:$0xff]  ;;  %v328_v21 = vlaneseq  ;;  %p301_p4 = scmp.lt.s32.totalorder %s953_s15, 1 }
  0x2a   : > { %s1088_s10 = scalar_lea.vmem [#allocation7], %s712_s30  ;;  %v366_v3 = vld [vmem:[%s247_s11] sm:$0xff]  ;;  %v330_v4 = vrot.slane %v326_v1, 4  ;;  %v336_v5 = vrot.slane %v327_v2, 4  ;;  %v714_v8 = vld [vmem:[%s247_s11 + $0x8] sm:$0xff]  ;;  %vm427_vm10 = vcmask 1041408  }
  0x2b   : > { %314 = vst [vmem:[%s1088_s10] sm:$0xf] %v965_v0  ;;  %v1094_v6 = vunpack.c.l.bf16 %v366_v3  ;;  %v1096_v7 = vunpack.c.h.bf16 %v366_v3  ;;  %v1098_v9 = vunpack.c.l.bf16 %v714_v8  ;;  %v1100_v10 = vunpack.c.h.bf16 %v714_v8  ;;  %s1132_s24 = scalar_select %p301_p4, %s953_s15, 1 }
  0x2c   : > { %315 = vst [vmem:[%s1088_s10 + $0x4] sm:$0xf] %v965_v0  ;;  %v331_v11 = vmax.f32 %v326_v1, %v330_v4  ;;  %v337_v12 = vmax.f32 %v327_v2, %v336_v5  ;;  %v1110_v34 = vshrl.u32 %v328_v21, 7  ;;  %s725_s4 = sshll.u32 %s953_s15, 3  ;;  %s563_s6 = sshll.u32 %s1088_s10, 4  ;;  %s564_s6 = int_to_ptr.vmem [resolvable:$true] %s563_s6 }
  0x2d   : > { %v371_v13 = vrot.slane %v1094_v6, 4  ;;  %v377_v14 = vrot.slane %v1096_v7, 4  ;;  %v466_v15 = vrot.slane %v1098_v9, 4  ;;  %v472_v16 = vrot.slane %v1100_v10, 4  ;;  %s713_s18 = sshll.u32 %s1132_s24, 2  ;;  %s562_s22 = scalar_lea.hbm %s1223_s3, %s725_s4 }
  0x2e   : > { %v332_v17 = vrot.slane %v331_v11, 2  ;;  %v338_v18 = vrot.slane %v337_v12, 2  ;;  %s307_s23 = scalar_lea.vmem %s1222_s2, %s713_s18  ;;  %s565_s7 = sshll.u32 %s562_s22, 4  ;;  %s566_s7 = int_to_ptr.hbm [resolvable:$true] %s565_s7 }
  0x2f   : > { %v372_v19 = vmax.f32 %v1094_v6, %v371_v13  ;;  %v378_v20 = vmax.f32 %v1096_v7, %v377_v14  ;;  %v467_v22 = vmax.f32 %v1098_v9, %v466_v15  ;;  %v473_v23 = vmax.f32 %v1100_v10, %v472_v16  ;;  %s549_s8 = scalar_lea.sflag [#allocation4], %s1074_s0  ;;  %s889_s9 = sshra.s32 %s566_s7, 4  ;;  %s890_s9 = int_to_ptr.hbm [resolvable:$true] %s889_s9 }
  0x30   : > { %v333_v24 = vmax.f32 %v331_v11, %v332_v17  ;;  %v339_v25 = vmax.f32 %v337_v12, %v338_v18  ;;  %s891_s11 = scalar_lea.hbm %s890_s9, 8  ;;  %s895_s30 = scalar_lea.hbm %s1223_s3, 16 }
  0x31   : > { %v373_v26 = vrot.slane %v372_v19, 2  ;;  %v379_v27 = vrot.slane %v378_v20, 2  ;;  %v468_v28 = vrot.slane %v467_v22, 2  ;;  %v474_v29 = vrot.slane %v473_v23, 2  ;;  %p892_p5 = scmp.ne.s32.totalorder %s890_s9, %s891_s11  ;;  %p896_p8 = scmp.lt.s32.totalorder %s890_s9, %s1223_s3 }
  0x32   : > { %v334_v30 = vrot.slane %v333_v24, 1  ;;  %v340_v31 = vrot.slane %v339_v25, 1  ;;  %p897_p10 = scmp.lt.s32.totalorder %s895_s30, %s891_s11 }
  0x33   : > { %v374_v32 = vmax.f32 %v372_v19, %v373_v26  ;;  %v380_v33 = vmax.f32 %v378_v20, %v379_v27  ;;  %v469_v35 = vmax.f32 %v467_v22, %v468_v28  ;;  %v475_v36 = vmax.f32 %v473_v23, %v474_v29  ;;  %p893_p6 = pnand %p892_p5, %p1040_p9 }
  0x34   : > { %v335_v37 = vmax.f32 %v333_v24, %v334_v30  ;;  %v341_v38 = vmax.f32 %v339_v25, %v340_v31  ;;  %p898_p13 = por %p897_p10, %p896_p8 }
  0x35   : > { %v375_v39 = vrot.slane %v374_v32, 1  ;;  %v381_v40 = vrot.slane %v380_v33, 1  ;;  %v470_v41 = vrot.slane %v469_v35, 1  ;;  %v476_v42 = vrot.slane %v475_v36, 1  ;;  %p894_p7 = pneg %p893_p6 }
  0x36   : > { %vm342_vm0 = vcmp.eq.f32.partialorder %v326_v1, %v335_v37  ;;  %vm343_vm1 = vcmp.eq.f32.partialorder %v327_v2, %v341_v38 }
  0x37   : > { %v1112_v43 = vmax.f32 %v374_v32, %v375_v39  ;;  %v1114_v44 = vmax.f32 %v380_v33, %v381_v40  ;;  %v344_v45 = vsel %vm342_vm0, %v1110_v34, 8  ;;  %v345_v46 = vsel %vm343_vm1, %v1110_v34, 8  ;;  %p899_p0 = pnand %p898_p13, %p894_p7 }
  0x38   : > { %v1118_v47 = vmax.f32 %v469_v35, %v470_v41  ;;  %v1120_v48 = vmax.f32 %v475_v36, %v476_v42  ;;  %v346_v49 = vrot.slane %v344_v45, 4  ;;  %v355_v50 = vrot.slane %v345_v46, 4 }
  0x39   : > { %v383_v51 = vsub.f32 %v1094_v6, %v1112_v43  ;;  %v384_v52 = vsub.f32 %v1096_v7, %v1114_v44  ;;  %v966_v42 = vmov 1   ;;  %vm448_vm0 = vcmask 1040384  }
  0x3a   : > { %v478_v53 = vsub.f32 %v1098_v9, %v1118_v47  ;;  %v479_v54 = vsub.f32 %v1100_v10, %v1120_v48  ;;  %vm347_vm2 = vcmp.lt.s32.totalorder %v344_v45, %v346_v49  ;;  %vm356_vm3 = vcmp.lt.s32.totalorder %v345_v46, %v355_v50 }
  0x3b   : > { %v385_v55 = vmul.f32 1.442695, %v383_v51  ;;  %v387_v56 = vmul.f32 1.442695, %v384_v52  ;;  %v348_v57 = vsel %vm347_vm2, %v344_v45, %v346_v49  ;;  %v357_v58 = vsel %vm356_vm3, %v345_v46, %v355_v50  ;;  %v369_v49 = vld [vmem:[%s307_s23] sm:$0x3] }
  0x3c   : > { %v349_v59 = vrot.slane %v348_v57, 2  ;;  %v358_v60 = vrot.slane %v357_v58, 2  ;;  %v480_v61 = vmul.f32 1.442695, %v478_v53  ;;  %v482_v62 = vmul.f32 1.442695, %v479_v54 }
  0x3d   : > { %799 = vpow2.f32 %v385_v55  ;;  %v426_v45 = vrot.slane %v966_v42, 6 }
  0x3e   : > { %801 = vpow2.f32 %v387_v56  ;;  %vm350_vm4 = vcmp.lt.s32.totalorder %v348_v57, %v349_v59  ;;  %vm359_vm5 = vcmp.lt.s32.totalorder %v357_v58, %v358_v60 }
  0x3f   : > { %v351_v63 = vsel %vm350_vm4, %v348_v57, %v349_v59  ;;  %v360_v1 = vsel %vm359_vm5, %v357_v58, %v358_v60  ;;  %803 = vpow2.f32 %v480_v61  ;;  %v370_v58 = vunpack.c.l.bf16 %v369_v49  ;;  %v715_v60 = vld [vmem:[%s307_s23 + $0x2] sm:$0x3] }
  0x40   : > { %v352_v2 = vrot.slane %v351_v63, 1  ;;  %v361_v3 = vrot.slane %v360_v1, 1  ;;  %805 = vpow2.f32 %v482_v62 }
  0x41   : > { %vm423_vm11 = vcmp.gt.f32.partialorder %v370_v58, 0.5 }
  0x42   : > { %vm353_vm6 = vcmp.lt.s32.totalorder %v351_v63, %v352_v2  ;;  %vm362_vm7 = vcmp.lt.s32.totalorder %v360_v1, %v361_v3 }
  0x43   : > { %v800_v4 = vpop.eup %799  ;;  %v354_v8 = vsel %vm353_vm6, %v351_v63, %v352_v2  ;;  %v363_v11 = vsel %vm362_vm7, %v360_v1, %v361_v3  ;;  %v428_v2 = vsel %vm427_vm10, 1, %v426_v45 }
  0x44   : > { %v802_v5 = vpop.eup %801  ;;  %v389_v12 = vrot.slane %v800_v4, 4  ;;  %vm364_vm8 = vcmp.eq.s32.totalorder %v1110_v34, %v354_v8  ;;  %vm365_vm9 = vcmp.eq.s32.totalorder %v1110_v34, %v363_v11  ;;  %vm429_vm12 = vcmp.ne.s32.totalorder %v428_v2, 0 }
  0x45   : > { %v395_v13 = vrot.slane %v802_v5, 4  ;;  %v804_v14 = vpop.eup %803  ;;  %v407_v16 = vsel %vm364_vm8, %v1094_v6, 0.0  ;;  %v408_v17 = vsel %vm365_vm9, %v1096_v7, 0.0  ;;  %v502_v18 = vsel %vm364_vm8, %v1098_v9, 0.0  ;;  %vm1148_vm13 = vmand %vm423_vm11, %vm429_vm12 }
  0x46   : > { %v390_v15 = vadd.f32 %v800_v4, %v389_v12  ;;  %v806_v19 = vpop.eup %805  ;;  %v409_v21 = vrot.slane %v407_v16, 4  ;;  %v415_v22 = vrot.slane %v408_v17, 4  ;;  %v484_v23 = vrot.slane %v804_v14, 4 }
  0x47   : > { %v396_v20 = vadd.f32 %v802_v5, %v395_v13  ;;  %v490_v25 = vrot.slane %v806_v19, 4  ;;  %v503_v26 = vsel %vm365_vm9, %v1100_v10, 0.0  ;;  %v504_v27 = vrot.slane %v502_v18, 4 }
  0x48   : > { %v391_v24 = vrot.slane %v390_v15, 2  ;;  %v410_v29 = vadd.f32 %v409_v21, %v407_v16  ;;  %v416_v30 = vadd.f32 %v415_v22, %v408_v17  ;;  %v485_v31 = vadd.f32 %v804_v14, %v484_v23 }
  0x49   : > { %v397_v28 = vrot.slane %v396_v20, 2  ;;  %v491_v32 = vadd.f32 %v806_v19, %v490_v25  ;;  %v510_v7 = vrot.slane %v503_v26, 4  ;;  %v505_v35 = vadd.f32 %v504_v27, %v502_v18 }
  0x4a   : > { %v392_v6 = vadd.f32 %v391_v24, %v390_v15  ;;  %v411_v9 = vrot.slane %v410_v29, 2  ;;  %v486_v34 = vrot.slane %v485_v31, 2  ;;  %v417_v37 = vrot.slane %v416_v30, 2 }
  0x4b   : > { %v398_v33 = vadd.f32 %v397_v28, %v396_v20  ;;  %v492_v10 = vrot.slane %v491_v32, 2  ;;  %v511_v38 = vadd.f32 %v510_v7, %v503_v26  ;;  %v506_v52 = vrot.slane %v505_v35, 2 }
  0x4c   : > { %v393_v36 = vrot.slane %v392_v6, 1  ;;  %v487_v40 = vadd.f32 %v486_v34, %v485_v31  ;;  %v412_v54 = vadd.f32 %v411_v9, %v410_v29  ;;  %v418_v55 = vadd.f32 %v417_v37, %v416_v30 }
  0x4d   : > { %v399_v39 = vrot.slane %v398_v33, 1  ;;  %v493_v46 = vadd.f32 %v492_v10, %v491_v32  ;;  %v512_v53 = vrot.slane %v511_v38, 2  ;;  %v507_v61 = vadd.f32 %v506_v52, %v505_v35 }
  0x4e   : > { %v394_v41 = vadd.f32 %v393_v36, %v392_v6  ;;  %v488_v51 = vrot.slane %v487_v40, 1  ;;  %v413_v63 = vrot.slane %v412_v54, 1  ;;  %v419_v1 = vrot.slane %v418_v55, 1 }
  0x4f   : > { %v400_v50 = vadd.f32 %v399_v39, %v398_v33  ;;  %v494_v56 = vrot.slane %v493_v46, 1  ;;  %v513_v62 = vadd.f32 %v512_v53, %v511_v38  ;;  %v465_v4 = vunpack.c.l.bf16 %v715_v60 }
  0x50   : > { %807 = vlog2.f32 %v394_v41  ;;  %v489_v57 = vadd.f32 %v488_v51, %v487_v40  ;;  %v508_v11 = vrot.slane %v507_v61, 1  ;;  %v414_v14 = vadd.f32 %v413_v63, %v412_v54  ;;  %v451_v41 = vld [vmem:[%s1088_s10] sm:$0xf]  ;;  %v716_v51 = vld [vmem:[%s1088_s10 + $0x4] sm:$0xf] }
  0x51   : > { %809 = vlog2.f32 %v400_v50  ;;  %v495_v59 = vadd.f32 %v494_v56, %v493_v46  ;;  %v514_v12 = vrot.slane %v513_v62, 1  ;;  %v420_v15 = vadd.f32 %v419_v1, %v418_v55 }
  0x52   : > { %811 = vlog2.f32 %v489_v57  ;;  %vm518_vm14 = vcmp.gt.f32.partialorder %v465_v4, 0.5  ;;  %v509_v23 = vadd.f32 %v508_v11, %v507_v61 }
  0x53   : > { %813 = vlog2.f32 %v495_v59  ;;  %v515_v24 = vadd.f32 %v514_v12, %v513_v62  ;;  %vm1158_vm15 = vmand %vm518_vm14, %vm429_vm12 }
  0x56   : > { %v808_v3 = vpop.eup %807 }
  0x57   : > { %v810_v5 = vpop.eup %809  ;;  %v402_v8 = vmul.f32 0.6931472, %v808_v3 }
  0x58   : > { %v404_v13 = vmul.f32 0.6931472, %v810_v5  ;;  %v812_v16 = vpop.eup %811 }
  0x59   : > { %v405_v17 = vadd.f32 %v402_v8, %v1112_v43  ;;  %v814_v18 = vpop.eup %813  ;;  %v497_v21 = vmul.f32 0.6931472, %v812_v16  ;;  %v437_v43 = vsel %vm1148_vm13, 1.0, %v965_v0 }
  0x5a   : > { %v406_v19 = vadd.f32 %v404_v13, %v1114_v44  ;;  %v499_v22 = vmul.f32 0.6931472, %v814_v18  ;;  %v444_v32 = vperm.slane %v437_v43, 0  ;;  %v445_v7 = vperm.slane %v437_v43, 2 }
  0x5b   : > { %v421_v25 = vsub.f32 %v405_v17, %v414_v14  ;;  %v500_v27 = vadd.f32 %v497_v21, %v1118_v47  ;;  %v526_v47 = vsel %vm1158_vm15, 1.0, %v965_v0 }
  0x5c   : > { %v422_v26 = vsub.f32 %v406_v19, %v420_v15  ;;  %v501_v44 = vadd.f32 %v499_v22, %v1120_v48  ;;  %v533_v36 = vperm.slane %v526_v47, 0  ;;  %v534_v37 = vperm.slane %v526_v47, 2 }
  0x5d   : > { %v516_v30 = vsub.f32 %v500_v27, %v509_v23 }
  0x5e   : > { %v433_v29 = vrot.slane %v422_v26, 6  ;;  %v517_v31 = vsub.f32 %v501_v44, %v515_v24 }
  0x60   : > { %v434_v6 = vsel %vm427_vm10, %v421_v25, %v433_v29  ;;  %v522_v33 = vrot.slane %v517_v31, 6 }
  0x61   : > { %v436_v48 = vsel %vm1148_vm13, %v434_v6, 0.0 }
  0x62   : > { %v439_v9 = vperm.slane %v436_v48, 0  ;;  %v440_v34 = vperm.slane %v436_v48, 2  ;;  %v523_v35 = vsel %vm427_vm10, %v516_v30, %v522_v33 }
  0x63   : > { %v525_v10 = vsel %vm1158_vm15, %v523_v35, 0.0 }
  0x64   : > { %v449_v0 = vsel %vm448_vm0, %v439_v9, %v444_v32  ;;  %v450_v38 = vsel %vm448_vm0, %v440_v34, %v445_v7  ;;  %v528_v39 = vperm.slane %v525_v10, 0  ;;  %v529_v40 = vperm.slane %v525_v10, 2 }
  0x65   : > { %v454_v42 = vrot.slane %v450_v38, 6 }
  0x66   : > { %v537_v46 = vsel %vm448_vm0, %v528_v39, %v533_v36  ;;  %v538_v49 = vsel %vm448_vm0, %v529_v40, %v534_v37 }
  0x67   : > { %v455_v45 = vsel %vm427_vm10, %v449_v0, %v454_v42  ;;  %v543_v52 = vrot.slane %v538_v49, 6 }
  0x68   : > { %v457_v50 = vadd.f32 %v455_v45, %v451_v41 }
  0x69   : > { %v544_v53 = vsel %vm427_vm10, %v537_v46, %v543_v52 }
  0x6a   : > { %458 = vst [vmem:[%s1088_s10] sm:$0xf] %v457_v50  ;;  %v546_v54 = vadd.f32 %v716_v51, %v544_v53 }
  0x6c   : > { %717 = vst [vmem:[%s1088_s10 + $0x4] sm:$0xf] %v546_v54 }
  0x6d   : > { %902 = shalt.err (!%p899_p0)
}
  0x6e   : > { %s967_s0 = smov 64   ;;  %s968_s10 = smov 4  }
  0x6f   : > { %730 = dma.vmem_to_hbm [thread:$0]  (%p1040_p9), %s564_s6, 128, %s566_s7, %s549_s8, %s967_s0, %s967_s0, %s968_s10  }
  0x70 PF: > { %s580_s19 = sand.u32 1, %s941_s12   ;;  %p740_p1 = pnand %p702_p12, %p1047_p11 }
  0x71   : > { %s581_s21 = scalar_lea.sflag [#allocation4], %s580_s19 }
  0x72   : > { %p741_p2 = pneg %p740_p1 }
  0x74   : > { %936 = dma.done.wait (%p741_p2), %s581_s21, 128  }
  0x75   : > { %938 = vsyncadd (%p741_p2), %s581_s21, 4294967168  ;;  %s22_s17 = sadd.s32 1, %s961_s17   ;;  %s1235_s12 = smov %s945_s13 }
  0x76   : > { %p19_p3 = scmp.ge.s32.totalorder %s22_s17, 4   ;;  %s1236_s13 = smov %s949_s14 }
  0x77   : > { %s1237_s14 = smov %s1045_s26  ;;  %s1238_s15 = smov %s957_s16 }
  0x78   : > { %s1239_s16 = smov %s1241_s20  ;;  %21 = sbr.rel (!%p19_p3) target bundleno = 10 (0xa), region = 100 }
  0x7d   :  { %587 = vsyncpa [#allocation3], 1 }
  0x7e   :  { %589 = vsyncpa [#allocation3 + $0x1], 1 }
  0x7f   :  { %590 = vsyncpa [#allocation6], 1 }
  0x80   :  { %592 = vsyncpa [#allocation6 + $0x1], 1 }
  0x81   :  { %593 = vsyncpa [#allocation4], 1 }
  0x82   :  { %595 = vsyncpa [#allocation4 + $0x1], 1 }

</bundles_post_ra>
